<compile_context>
chip_gen: v5e
topology: v5e:2x2
jax: 0.10.0
libtpu: 0.0.40
codegen_flags: <defaults>
</compile_context>

<pallas_src>
import functools

import jax
import jax.numpy as jnp
from jax import lax
from jax.experimental import pallas as pl
from jax.experimental.pallas import tpu as pltpu

_LANE = 128
_TK_MAX = 32768                      # sanity cap on the lane-dense tile width
_VMEM_SLACK_BYTES = 4 * 1024 * 1024  # headroom for compiler-internal scratch


@functools.lru_cache(maxsize=1)
def _tpu_caps():
    """Per-generation (vmem_limit_bytes, num_tensorcore_splits)."""
    kind = ""
    try:
        kind = jax.devices()[0].device_kind.lower()
    except Exception:
        pass
    vmem_cap = None
    try:
        vmem_cap = int(pltpu.get_tpu_info().vmem_capacity_bytes)
    except Exception:
        vmem_cap = None

    # Dual-TensorCore parts (v7x, megacore v4/v5p): shard "parallel" grid axes.
    dual_core = any(tag in kind for tag in ("v4", "v5p", "7"))
    if vmem_cap is None:
        big_vmem = any(tag in kind for tag in ("v5 lite", "v5e", "v5lite", "v6"))
        vmem_cap = (128 if big_vmem else 64) * 1024 * 1024
    if dual_core:
        # v7x VMEM is per-TensorCore (64 MiB); be conservative on megacore too.
        vmem_cap = min(vmem_cap, 64 * 1024 * 1024)

    vmem_limit = min((vmem_cap * 3) // 4, 96 * 1024 * 1024)
    return int(vmem_limit), (2 if dual_core else 1)


def _pick_tile(n, m, itemsize, resident_bytes, vmem_limit):
    """Largest lane-dense TK whose double-buffered (N, TK) tile fits VMEM."""
    budget = max(vmem_limit - resident_bytes - _VMEM_SLACK_BYTES,
                 2 * n * _LANE * itemsize)
    tk = min(budget // (2 * n * itemsize), _TK_MAX)
    m_pad = pl.cdiv(m, _LANE) * _LANE
    if tk >= m_pad:
        return m  # single block spanning the full (unpadded) spatial axis
    return max(_LANE, (tk // _LANE) * _LANE)


def _masked(f, col0, m):
    """Zero out lanes whose global column index is >= m (ragged / OOB tiles)."""
    cols = lax.broadcasted_iota(jnp.int32, f.shape, 1) + col0
    return jnp.where(cols < m, f, jnp.zeros_like(f))


def _gram_kernel(f_ref, g_ref, *, inv_scale, m, tk, need_mask):
    """Streaming Gram: accumulate F_k @ F_k^T directly into the resident output."""
    k = pl.program_id(0)

    @pl.when(k == 0)
    def _():
        g_ref[...] = jnp.zeros_like(g_ref)

    f = f_ref[...]
    if need_mask:
        f = _masked(f, k * tk, m)
    g_ref[...] += lax.dot_general(
        f, f,
        dimension_numbers=(((1,), (1,)), ((), ())),  # contract axis 1 of both
        preferred_element_type=jnp.float32,
    )

    @pl.when(k == pl.num_programs(0) - 1)
    def _():
        g_ref[...] = g_ref[...] * inv_scale


def _style_loss_kernel(f_ref, tgt_ref, loss_ref, acc_ref, *,
                       inv_nm, inv_nn, m, tk, need_mask):
    """Fused streaming Gram + MSE against the resident target Gram (1 core)."""
    k = pl.program_id(0)

    @pl.when(k == 0)
    def _():
        acc_ref[...] = jnp.zeros_like(acc_ref)

    f = f_ref[...]
    if need_mask:
        f = _masked(f, k * tk, m)
    acc_ref[...] += lax.dot_general(
        f, f,
        dimension_numbers=(((1,), (1,)), ((), ())),
        preferred_element_type=jnp.float32,
    )

    @pl.when(k == pl.num_programs(0) - 1)
    def _():
        diff = acc_ref[...] * inv_nm - tgt_ref[...]
        loss_ref[0, 0] = jnp.sum(diff * diff) * inv_nn


def _gram_partial_kernel(f_ref, g_ref, *, m, tk, kpc, need_mask):
    """Per-core partial Gram (leading 'parallel' grid axis splits M)."""
    k = pl.program_id(1)

    @pl.when(k == 0)
    def _():
        g_ref[...] = jnp.zeros_like(g_ref)

    f = f_ref[...]
    if need_mask:
        b = pl.program_id(0) * kpc + k  # unclamped global tile index
        f = _masked(f, b * tk, m)
    g_ref[...] += lax.dot_general(
        f, f,
        dimension_numbers=(((1,), (1,)), ((), ())),
        preferred_element_type=jnp.float32,
    )


def gram_matrix(x, *, tile_k=None, feature_dtype=None):
    """Pallas equivalent of the PyTorch gram_matrix helper (returns f32 N x N)."""
    a, b, c, d = x.shape
    n, m = a * b, c * d
    f = x.reshape(n, m)
    if feature_dtype is not None:
        f = f.astype(feature_dtype)
    itemsize = jnp.dtype(f.dtype).itemsize
    vmem_limit, _ = _tpu_caps()
    resident = 2 * n * n * 4  # double-buffered f32 output Gram
    tk = tile_k if tile_k is not None else _pick_tile(n, m, itemsize, resident,
                                                      vmem_limit)
    grid_k = pl.cdiv(m, tk)
    need_mask = (m % tk) != 0
    kernel = functools.partial(_gram_kernel, inv_scale=1.0 / (n * m),
                               m=m, tk=tk, need_mask=need_mask)
    return pl.pallas_call(
        kernel,
        out_shape=jax.ShapeDtypeStruct((n, n), jnp.float32),
        grid_spec=pltpu.PrefetchScalarGridSpec(
            num_scalar_prefetch=0,
            grid=(grid_k,),
            in_specs=[pl.BlockSpec((n, tk), lambda k: (0, k))],
            out_specs=pl.BlockSpec((n, n), lambda k: (0, 0)),
        ),
        compiler_params=pltpu.CompilerParams(
            dimension_semantics=("arbitrary",),
            vmem_limit_bytes=vmem_limit,
        ),
    )(f)


class StyleLoss:
    """JAX/Pallas port of the PyTorch StyleLoss module.

    __init__ stores the (detached) Gram matrix of the target feature map.
    __call__ computes self.loss = mse(gram(input), target) and returns the
    input unchanged (the module is transparent in the forward graph).

    Note: `tile_k`, if given, must be a multiple of 128 (or equal to H*W).
    `self.loss` is a Python attribute side effect, matching the PyTorch API
    (it does not compose with jit/grad over __call__).
    """

    def __init__(self, target_feature, *, tile_k=None, feature_dtype=None,
                 num_core_splits=None):
        self._tile_k = tile_k
        self._feature_dtype = feature_dtype
        vmem_limit, cores = _tpu_caps()
        self._vmem_limit = vmem_limit
        self._splits = int(num_core_splits) if num_core_splits else cores
        self.target = lax.stop_gradient(
            gram_matrix(target_feature, tile_k=tile_k, feature_dtype=feature_dtype))
        self.loss = None

    def __call__(self, x):
        a, b, c, d = x.shape
        n, m = a * b, c * d
        f = x.reshape(n, m)
        if self._feature_dtype is not None:
            f = f.astype(self._feature_dtype)
        itemsize = jnp.dtype(f.dtype).itemsize
        vmem_limit = self._vmem_limit
        inv_nm = 1.0 / (n * m)
        inv_nn = 1.0 / (n * n)
        splits = max(1, self._splits)

        if splits > 1:
            # Dual-TensorCore path: split the M reduction across cores via a
            # leading "parallel" axis; combine + MSE in a tiny JAX epilogue.
            resident = 2 * n * n * 4  # double-buffered per-core partial Gram
            tk = self._tile_k if self._tile_k is not None else _pick_tile(
                n, m, itemsize, resident, vmem_limit)
            grid_k = pl.cdiv(m, tk)
            kpc = pl.cdiv(grid_k, splits)
            need_mask = (m % tk != 0) or (grid_k % splits != 0)
            kernel = functools.partial(_gram_partial_kernel, m=m, tk=tk,
                                       kpc=kpc, need_mask=need_mask)
            partials = pl.pallas_call(
                kernel,
                out_shape=jax.ShapeDtypeStruct((splits, n, n), jnp.float32),
                grid_spec=pltpu.PrefetchScalarGridSpec(
                    num_scalar_prefetch=0,
                    grid=(splits, kpc),
                    in_specs=[pl.BlockSpec(
                        (n, tk),
                        # Clamp the tile index for the tail core; the clamped
                        # (duplicate) tile is zeroed in-kernel via the mask.
                        lambda cc, k: (0, jnp.minimum(cc * kpc + k, grid_k - 1)))],
                    out_specs=pl.BlockSpec((None, n, n), lambda cc, k: (cc, 0, 0)),
                ),
                compiler_params=pltpu.CompilerParams(
                    dimension_semantics=("parallel", "arbitrary"),
                    vmem_limit_bytes=vmem_limit,
                ),
            )(f)
            g = partials.sum(axis=0) * inv_nm
            loss = jnp.mean(jnp.square(g - self.target))
        else:
            # Single-core path: fully fused Gram + MSE, target Gram resident.
            resident = 3 * n * n * 4  # 2x target (double-buffered) + accumulator
            tk = self._tile_k if self._tile_k is not None else _pick_tile(
                n, m, itemsize, resident, vmem_limit)
            grid_k = pl.cdiv(m, tk)
            need_mask = (m % tk) != 0
            kernel = functools.partial(_style_loss_kernel, inv_nm=inv_nm,
                                       inv_nn=inv_nn, m=m, tk=tk,
                                       need_mask=need_mask)
            loss = pl.pallas_call(
                kernel,
                out_shape=jax.ShapeDtypeStruct((1, 1), jnp.float32),
                grid_spec=pltpu.PrefetchScalarGridSpec(
                    num_scalar_prefetch=0,
                    grid=(grid_k,),
                    in_specs=[
                        pl.BlockSpec((n, tk), lambda k: (0, k)),
                        # target Gram: constant block index -> DMA'd once, resident.
                        pl.BlockSpec((n, n), lambda k: (0, 0)),
                    ],
                    out_specs=pl.BlockSpec((1, 1), lambda k: (0, 0)),
                    scratch_shapes=[pltpu.VMEM((n, n), jnp.float32)],
                ),
                compiler_params=pltpu.CompilerParams(
                    dimension_semantics=("arbitrary",),
                    vmem_limit_bytes=vmem_limit,
                ),
            )(f, self.target)[0, 0]

        self.loss = loss
        return x


def _gram_ref(x):
    a, b, c, d = x.shape
    f = x.reshape(a * b, c * d).astype(jnp.float32)
    return (f @ f.T) / (a * b * c * d)


if __name__ == "__main__":
    key = jax.random.PRNGKey(0)
    k_tgt, k_in, k_tgt2, k_in2, k_tgt3, k_in3 = jax.random.split(key, 6)

    # Case 1: N = 2*4 = 8, M = 16*16 = 256 (lane-aligned).
    target_feature = jax.random.normal(k_tgt, (2, 4, 16, 16), dtype=jnp.float32)
    x = jax.random.normal(k_in, (2, 4, 16, 16), dtype=jnp.float32)
    g_t = _gram_ref(target_feature)
    loss_ref = jnp.mean((_gram_ref(x) - g_t) ** 2)

    # Fused single-core path (tile_k=128 forces a 2-step reduction grid).
    m_fused = StyleLoss(target_feature, tile_k=128, num_core_splits=1)
    out = jax.block_until_ready(m_fused(x))
    assert out.shape == x.shape and jnp.allclose(out, x)       # forward identity
    assert jnp.allclose(m_fused.target, g_t, atol=1e-5, rtol=1e-5)
    assert jnp.allclose(jax.block_until_ready(m_fused.loss), loss_ref,
                        atol=1e-5, rtol=1e-5)

    # Dual-TensorCore split path (also correct when run on a single core).
    m_split = StyleLoss(target_feature, tile_k=128, num_core_splits=2)
    _ = jax.block_until_ready(m_split(x))
    assert jnp.allclose(jax.block_until_ready(m_split.loss), loss_ref,
                        atol=1e-5, rtol=1e-5)

    # Auto configuration: per-generation VMEM budget + core-count detection.
    m_auto = StyleLoss(target_feature)
    _ = jax.block_until_ready(m_auto(x))
    assert jnp.allclose(jax.block_until_ready(m_auto.loss), loss_ref,
                        atol=1e-5, rtol=1e-5)

    # Case 2: ragged M (12*12 = 144): exercises the in-kernel lane mask
    # (no jnp.pad HBM round-trip).
    tf2 = jax.random.normal(k_tgt2, (1, 8, 12, 12), dtype=jnp.float32)
    x2 = jax.random.normal(k_in2, (1, 8, 12, 12), dtype=jnp.float32)
    ref2 = jnp.mean((_gram_ref(x2) - _gram_ref(tf2)) ** 2)
    for splits in (1, 2):
        mod = StyleLoss(tf2, tile_k=128, num_core_splits=splits)
        _ = jax.block_until_ready(mod(x2))
        assert jnp.allclose(jax.block_until_ready(mod.loss), ref2,
                            atol=1e-5, rtol=1e-5)

    # Case 3: 3 tiles over 2 cores: exercises the clamped + fully-masked tail tile.
    tf3 = jax.random.normal(k_tgt3, (1, 8, 16, 24), dtype=jnp.float32)
    x3 = jax.random.normal(k_in3, (1, 8, 16, 24), dtype=jnp.float32)
    ref3 = jnp.mean((_gram_ref(x3) - _gram_ref(tf3)) ** 2)
    mod3 = StyleLoss(tf3, tile_k=128, num_core_splits=2)
    _ = jax.block_until_ready(mod3(x3))
    assert jnp.allclose(jax.block_until_ready(mod3.loss), ref3,
                        atol=1e-5, rtol=1e-5)

    # Optional bf16 feature streaming (halved HBM bytes, f32 accumulation).
    m_bf16 = StyleLoss(target_feature, tile_k=128, feature_dtype=jnp.bfloat16)
    _ = jax.block_until_ready(m_bf16(x))
    rel = abs(float(m_bf16.loss) - float(loss_ref)) / max(float(loss_ref), 1e-12)
    assert rel < 0.25

    print("KERNEL_OK")
</pallas_src>

<mosaic_0001>
module attributes {stable_mosaic.version = 11 : i64} {
  func.func @_gram_kernel(%arg0: i32, %arg1: memref<8x128xf32, #tpu.memory_space<vmem>>, %arg2: memref<8x8xf32, #tpu.memory_space<vmem>>) attributes {dimension_semantics = [#tpu.dimension_semantics<arbitrary>], iteration_bounds = array<i64: 2>, scalar_prefetch = 0 : i64, scratch_operands = 0 : i64, tpu.core_type = #tpu.core_type<tc>, window_params = [{transform_indices = @transform_0, window_bounds = array<i64: 8, 128>}, {pipeline_mode = #tpu.pipeline_mode<synchronous>, transform_indices = @transform_1, window_bounds = array<i64: 8, 8>}]} {
    %c0_i32 = arith.constant 0 : i32
    %0 = arith.cmpi eq, %arg0, %c0_i32 : i32
    %1 = arith.extui %0 : i1 to i32
    %c0_i32_0 = arith.constant 0 : i32
    %2 = arith.cmpi ne, %1, %c0_i32_0 : i32
    scf.if %2 {
      %cst_7 = arith.constant 0.000000e+00 : f32
      %11 = vector.broadcast %cst_7 : f32 to vector<8x8xf32>
      %c0_8 = arith.constant 0 : index
      %c0_9 = arith.constant 0 : index
      %12 = vector.load %arg2[%c0_8, %c0_9] : memref<8x8xf32, #tpu.memory_space<vmem>>, vector<8x8xf32>
      tpu.vector_store %arg2[%c0_8, %c0_9], %11 {strides = array<i32>} : memref<8x8xf32, #tpu.memory_space<vmem>>, vector<8x8xf32>,
    } else {
    }
    %c0 = arith.constant 0 : index
    %c0_1 = arith.constant 0 : index
    %3 = vector.load %arg1[%c0, %c0_1] : memref<8x128xf32, #tpu.memory_space<vmem>>, vector<8x128xf32>
    %c0_2 = arith.constant 0 : index
    %c0_3 = arith.constant 0 : index
    %4 = vector.load %arg2[%c0_2, %c0_3] : memref<8x8xf32, #tpu.memory_space<vmem>>, vector<8x8xf32>
    %cst = arith.constant dense<0.000000e+00> : vector<8x8xf32>
    %5 = tpu.matmul %3, %3, %cst {dimension_numbers = #tpu.dot_dimension_numbers<[1], [1], [0], [0], [0, 0, 1, 0], [], []>} : vector<8x128xf32>, vector<8x128xf32>, vector<8x8xf32> -> vector<8x8xf32>
    %6 = arith.addf %4, %5 : vector<8x8xf32>
    %c0_4 = arith.constant 0 : index
    %c0_5 = arith.constant 0 : index
    %7 = vector.load %arg2[%c0_4, %c0_5] : memref<8x8xf32, #tpu.memory_space<vmem>>, vector<8x8xf32>
    tpu.vector_store %arg2[%c0_4, %c0_5], %6 {strides = array<i32>} : memref<8x8xf32, #tpu.memory_space<vmem>>, vector<8x8xf32>,
    %c1_i32 = arith.constant 1 : i32
    %8 = arith.cmpi eq, %arg0, %c1_i32 : i32
    %9 = arith.extui %8 : i1 to i32
    %c0_i32_6 = arith.constant 0 : i32
    %10 = arith.cmpi ne, %9, %c0_i32_6 : i32
    scf.if %10 {
      %c0_7 = arith.constant 0 : index
      %c0_8 = arith.constant 0 : index
      %11 = vector.load %arg2[%c0_7, %c0_8] : memref<8x8xf32, #tpu.memory_space<vmem>>, vector<8x8xf32>
      %cst_9 = arith.constant 4.8828125E-4 : f32
      %12 = vector.broadcast %cst_9 : f32 to vector<8x8xf32>
      %13 = arith.mulf %11, %12 : vector<8x8xf32>
      %c0_10 = arith.constant 0 : index
      %c0_11 = arith.constant 0 : index
      %14 = vector.load %arg2[%c0_10, %c0_11] : memref<8x8xf32, #tpu.memory_space<vmem>>, vector<8x8xf32>
      tpu.vector_store %arg2[%c0_10, %c0_11], %13 {strides = array<i32>} : memref<8x8xf32, #tpu.memory_space<vmem>>, vector<8x8xf32>,
    } else {
    }
    return
  }
  func.func @transform_0(%arg0: i32) -> (i32, i32) {
    %c0_i32 = arith.constant 0 : i32
    %c0_i32_0 = arith.constant 0 : i32
    return %c0_i32, %arg0 : i32, i32
  }
  func.func @transform_1(%arg0: i32) -> (i32, i32) {
    %c0_i32 = arith.constant 0 : i32
    %c0_i32_0 = arith.constant 0 : i32
    %c0_i32_1 = arith.constant 0 : i32
    return %c0_i32, %c0_i32_0 : i32, i32
  }
}

</mosaic_0001>

<bundles_post_ra>
// kernel: tpu_custom_call.1
= control target key start
LH: loop header
LB: loop body
LE: loop exit
PB: predicated region body
PF: predicated region fallthrough
CT: control target
= control target key end

     0   :  { %6 = vsyncpa [#allocation3], 0  ;;  %s484_s0 = inlined_call_operand.hbm [shape: f32[8,256], index: 0, kind: input, shape index: {}]   ;;  %s485_s1 = inlined_call_operand.hbm [shape: f32[8,8], index: 1, kind: output, shape index: {}]  }
   0x1   :  { %8 = vsyncpa [#allocation3 + $0x1], 0 }
   0x2   :  { %9 = vsyncpa [#allocation4], 0  ;;  %s389_s6 = smov 0   ;;  %s391_s7 = smov 0  }
   0x3   :  { %s393_s8 = smov 0   ;;  %s395_s9 = smov 0  }
   0x4 LB: > { %s408_s10 = sadd.s32 4294967295, %s375_s9   ;;  %s411_s11 = sadd.s32 1, %s375_s9   ;;  %s375_s9 = sphi %s395_s9, %s492_s9   ;;  %s371_s8 = sphi %s393_s8, %s491_s8   ;;  %s367_s7 = sphi %s391_s7, %s490_s7   ;;  %s363_s6 = sphi %s389_s6, %s489_s6  }
   0x5   : > { %s19_s12 = ssub.s32 %s375_s9, %s411_s11  ;;  %s22_s13 = sadd.s32 1, %s371_s8 }
   0x6   : > { %p20_p0 = scmp.eq.s32.totalorder %s19_s12, 0  ;;  %p29_p1 = scmp.ne.s32.totalorder %s371_s8, %s367_s7 }
   0x7   : > { %p30_p2 = scmp.eq.s32.totalorder %s375_s9, 0  ;;  %p35_p3 = scmp.ne.s32.totalorder %s367_s7, %s363_s6 }
   0x8   : > { %s421_s14 = scalar_select %p20_p0, %s371_s8, %s22_s13  }
   0x9   : > { %p423_p4 = por %p30_p2, %p29_p1  ;;  %p36_p5 = scmp.eq.s32.totalorder %s408_s10, 0 }
   0xa   : > { %p242_p6 = scmp.lt.s32.totalorder %s375_s9, 2  ;;  %s80_s17 = sand.u32 1, %s371_s8  }
   0xb   : > { %p429_p7 = por %p36_p5, %p35_p3  ;;  %s222_s18 = sshll.u32 %s80_s17, 3 }
   0xc   : > { %s223_s19 = sshll.u32 %s375_s9, 3  ;;  %s84_s23 = scalar_lea.vmem [#allocation2], %s222_s18 }
   0xd   : > { %s88_s22 = scalar_lea.hbm %s484_s0, %s223_s19  ;;  %s92_s24 = sshll.u32 %s84_s23, 4  ;;  %s93_s24 = int_to_ptr.vmem [resolvable:$true] %s92_s24 }
   0xe   : > { %s90_s25 = sshll.u32 %s88_s22, 4  ;;  %p440_p8 = pnand %p242_p6, %p423_p4  ;;  %s91_s25 = int_to_ptr.hbm [resolvable:$true] %s90_s25 }
   0xf   : > { %p224_p9 = scmp.ge.s32.totalorder %s375_s9, 1  ;;  %p97_p10 = scmp.lt.s32.totalorder %s375_s9, 3 }
  0x10   : > { %s81_s27 = scalar_lea.sflag [#allocation3], %s80_s17  ;;  %s279_s28 = sshra.s32 %s91_s25, 4  ;;  %s280_s28 = int_to_ptr.hbm [resolvable:$true] %s279_s28 }
  0x11   : > { %s281_s29 = scalar_lea.hbm %s280_s28, 8  ;;  %p283_p12 = pneg %p440_p8 }
  0x12   : > { %p282_p11 = scmp.ne.s32.totalorder %s280_s28, %s281_s29  ;;  %s286_s3 = scalar_lea.hbm %s484_s0, 16 }
  0x13   : > { %p287_p1 = scmp.lt.s32.totalorder %s280_s28, %s484_s0  ;;  %p288_p2 = scmp.lt.s32.totalorder %s286_s3, %s281_s29 }
  0x14   : > { %p284_p13 = pnand %p283_p12, %p282_p11 }
  0x15   : > { %p289_p3 = por %p288_p2, %p287_p1 }
  0x16   : > { %p285_p0 = pneg %p284_p13 }
  0x18   : > { %p290_p4 = pnand %p289_p3, %p285_p0 }
  0x1a   : > { %293 = shalt.err (!%p290_p4)
}
  0x1b   : > { %241 = dma.hbm_to_vmem [thread:$0]  (!%p440_p8), %s91_s25, 128, %s93_s24, %s81_s27  }
  0x1c   : > { %p98_p5 = pnand %p224_p9, %p97_p10 }
  0x1d   : > { %s103_s6 = sand.u32 (!%p98_p5), 1, %s367_s7  }
  0x1e   : > { %101 = sbr.rel (%p98_p5) target bundleno = 193 (0xc1), region = 24  ;;  %s225_s12 = sshll.u32 (!%p98_p5), %s103_s6, 3 }
  0x1f   : > { %s104_s13 = scalar_lea.sflag (!%p98_p5), [#allocation3], %s103_s6  ;;  %s107_s15 = scalar_lea.vmem (!%p98_p5), [#allocation2], %s225_s12 }
  0x23   : > { %354 = dma.done.wait (%p429_p7), %s104_s13, 128  }
  0x24   : > { %356 = vsyncadd (%p429_p7), %s104_s13, 4294967168  ;;  %p226_p6 = scmp.ne.s32.totalorder %s408_s10, 0 }
  0x26   : > { %125 = sbr.rel (%p226_p6) target bundleno = 45 (0x2d), region = 32 }
  0x2b   : > { %vm126_vm0 = vcmask 64512   ;;  %v377_v0 = vmov 0.0  }
  0x2c   : > { %127 = vst.msk [vmem:[#allocation5] sm:$0xff] %vm126_vm0, %v377_v0 }
  0x2d PF: > { %v128_v1 = vld [vmem:[%s107_s15] sm:$0xff]  ;;  %vm151_vm1 = vcmask 64512   ;;  %p227_p8 = scmp.ne.s32.totalorder %s408_s10, 1 }
  0x2e   : > { %145 = vmatpush.xpose.msra.mxu0 %v128_v1 }
  0x31   : > { %146 = vmatmul.f32.vlgmr.msra.gmra.mxu0 %v128_v1 }
  0x33   : > { %v129_v2 = vld [vmem:[#allocation5] sm:$0xff] }
  0xad   : > { %156 = sbr.rel (%p227_p8) target bundleno = 188 (0xbc), region = 36 }
  0xae   : > { %v147_v3 = vpop.f32.mrf.mxu0 }
  0xaf   : > { %v150_v4 = vadd.f32 %v147_v3, %v129_v2 }
  0xb1   : > { %152 = vst.msk [vmem:[#allocation5] sm:$0xff] %vm151_vm1, %v150_v4 }
  0xb8   : > { %v157_v5 = vld [vmem:[#allocation5] sm:$0xff] }
  0xb9   : > { %v158_v6 = vmul.f32 0.00048828125, %v157_v5 }
  0xbb   : > { %159 = vst.msk [vmem:[#allocation5] sm:$0xff] %vm151_vm1, %v158_v6 }
  0xbc PF: > { %p243_p7 = scmp.eq.s32.totalorder %s408_s10, 1  ;;  %s378_s9 = smov [#allocation5]  }
  0xbd   : > { %s166_s16 = sshll.u32 %s378_s9, 4  ;;  %s168_s19 = sshll.u32 %s485_s1, 4  ;;  %s167_s16 = int_to_ptr.vmem [resolvable:$true] %s166_s16  ;;  %s169_s19 = int_to_ptr.hbm [resolvable:$true] %s168_s19 }
  0xbe   : > { %235 = dma.vmem_to_hbm [thread:$0]  (%p243_p7), %s167_s16, 128, %s169_s19, [#allocation4]  }
  0xbf   : > { %358 = dma.done.wait (%p243_p7), [#allocation4], 128  }
  0xc0   : > { %360 = vsyncadd (%p243_p7), [#allocation4], 4294967168 }
  0xc1 PF: > { %p12_p9 = scmp.ge.s32.totalorder %s411_s11, 4   ;;  %s489_s6 = smov %s367_s7 }
  0xc2   : > { %s490_s7 = smov %s371_s8  ;;  %s491_s8 = smov %s421_s14 }
  0xc3   : > { %s492_s9 = smov %s411_s11  ;;  %14 = sbr.rel (!%p12_p9) target bundleno = 4 (0x4), region = 69 }
  0xc8   :  { %182 = vsyncpa [#allocation3], 1 }
  0xc9   :  { %184 = vsyncpa [#allocation3 + $0x1], 1 }
  0xca   :  { %185 = vsyncpa [#allocation4], 1 }
  0xcb   :  { %187 = vsyncpa [#allocation4 + $0x1], 1 }

</bundles_post_ra>
